<compile_context>
chip_gen: v5e
topology: v5e:2x2
jax: 0.10.0
libtpu: 0.0.40
codegen_flags: <defaults>
</compile_context>

<pallas_src>
import functools
import random

import numpy as np
import jax
import jax.numpy as jnp
from jax import lax
from jax.experimental import pallas as pl
from jax.experimental.pallas import tpu as pltpu


def _round_up(x, m):
    return ((x + m - 1) // m) * m


# ----------------------------------------------------------------------------
# Pallas kernel: batched cluster merge (Bt batch elements per grid step)
# ----------------------------------------------------------------------------
def _slot_merge_kernel(*refs, num_slots, has_attn, d_pad, n_real, n_pad):
    if has_attn:
        labels_ref, slots_ref, attn_ref, new_slots_ref, new_attn_ref = refs
    else:
        labels_ref, slots_ref, new_slots_ref = refs
        attn_ref = new_attn_ref = None

    # labels_ref: (Bt, 1, S) int32 ; slots_ref: (Bt, S, Dp) ; attn_ref: (Bt, S, Np)
    lbl = labels_ref[...]                                       # (Bt, 1, S)
    bt = lbl.shape[0]
    s = lbl.shape[-1]
    c = num_slots

    # clusters[b, ci, j] = 1.0 iff slot j of batch b belongs to cluster ci
    # (== eye(num_slots)[labels].transpose(1, 2) in the PyTorch module)
    cid = lax.broadcasted_iota(jnp.int32, (bt, c, s), 1)
    clusters = (cid == lbl).astype(jnp.float32)                 # (Bt, C, S)

    # members per cluster (internal only; not a kernel output)
    counts = jnp.sum(clusters, axis=-1, keepdims=True)          # (Bt, C, 1)
    inv_counts = 1.0 / (counts + 1e-8)                          # column recip

    slots = slots_ref[...].astype(jnp.float32)                  # (Bt, S, Dp)
    if has_attn:
        attn = attn_ref[...].astype(jnp.float32)                # (Bt, S, Np)
        rhs = jnp.concatenate([slots, attn], axis=-1)           # (Bt, S, Dp+Np)
    else:
        rhs = slots

    # single fused MXU pass per batch element
    merged = jnp.einsum('bcs,bsf->bcf', clusters, rhs,
                        preferred_element_type=jnp.float32)     # (Bt, C, Dp+Np)

    new_slots = merged[:, :, :d_pad] * inv_counts
    new_slots_ref[...] = new_slots.astype(new_slots_ref.dtype)

    if has_attn:
        attn_part = merged[:, :, d_pad:]                        # (Bt, C, Np)
        if n_pad > n_real:
            # padded lanes must not receive the epsilon (keeps renorm exact)
            lane = lax.broadcasted_iota(jnp.int32, attn_part.shape, 2)
            eps = jnp.where(lane < n_real, jnp.float32(1e-8), jnp.float32(0.0))
        else:
            eps = jnp.float32(1e-8)
        m = attn_part + eps
        inv_den = 1.0 / jnp.sum(m, axis=-1, keepdims=True)
        new_attn_ref[...] = (m * inv_den).astype(new_attn_ref.dtype)


def _vmem_capacity_bytes():
    try:
        info = pltpu.get_tpu_info()
        cap = getattr(info, "vmem_capacity_bytes", None)
        if cap:
            return int(cap)
    except Exception:
        pass
    return 64 * 1024 * 1024   # conservative fallback (v7x per-TC physical)


def slot_merger_forward(slots, patch_attn, labels, *, num_slots, batch_tile=16):
    """Device-side part of Slot_Merger.forward.

    slots:      (B, S, D) float
    patch_attn: (B, S, N) float or None
    labels:     (B, S) int  -- cluster id per slot (host clustering result)

    Returns (new_slots, new_patch_attn_or_None, slot_nums), like the module.
    """
    B, S, D = slots.shape
    C = num_slots
    has_attn = patch_attn is not None
    N = patch_attn.shape[-1] if has_attn else 0

    Dp = _round_up(D, 128)
    Np = _round_up(N, 128) if has_attn else 0

    # Choose a batch tile: as many batch elements per grid step as fit a
    # modest VMEM budget (amortizes per-step overhead; keeps DMAs fat).
    per_batch = 4 * (8 * 128 + _round_up(S, 8) * Dp + _round_up(C, 8) * Dp)
    if has_attn:
        per_batch += 4 * (_round_up(S, 8) * Np + _round_up(C, 8) * Np)
    Bt = max(1, min(B, batch_tile, (6 * 1024 * 1024) // max(per_batch, 1)))
    G = pl.cdiv(B, Bt)
    B_pad = G * Bt

    labels3 = labels.astype(jnp.int32).reshape(B, 1, S)
    slots_in = slots
    attn_in = patch_attn
    if Dp != D:
        slots_in = jnp.pad(slots_in, ((0, 0), (0, 0), (0, Dp - D)))
    if has_attn and Np != N:
        attn_in = jnp.pad(attn_in, ((0, 0), (0, 0), (0, Np - N)))
    if B_pad != B:
        bpad = ((0, B_pad - B), (0, 0), (0, 0))
        labels3 = jnp.pad(labels3, bpad)
        slots_in = jnp.pad(slots_in, bpad)
        if has_attn:
            attn_in = jnp.pad(attn_in, bpad)

    in_specs = [
        pl.BlockSpec((Bt, 1, S), lambda g: (g, 0, 0)),          # labels
        pl.BlockSpec((Bt, S, Dp), lambda g: (g, 0, 0)),         # slots
    ]
    inputs = [labels3, slots_in]
    out_shapes = [jax.ShapeDtypeStruct((B_pad, C, Dp), slots.dtype)]
    out_specs = [pl.BlockSpec((Bt, C, Dp), lambda g: (g, 0, 0))]

    flops = 2 * B_pad * C * S * Dp
    bytes_accessed = 4 * B_pad * (S + S * Dp + C * Dp)
    block_bytes = 4 * Bt * (8 * 128 + _round_up(S, 8) * Dp + _round_up(C, 8) * Dp)

    if has_attn:
        in_specs.append(pl.BlockSpec((Bt, S, Np), lambda g: (g, 0, 0)))
        inputs.append(attn_in)
        out_shapes.append(jax.ShapeDtypeStruct((B_pad, C, Np), patch_attn.dtype))
        out_specs.append(pl.BlockSpec((Bt, C, Np), lambda g: (g, 0, 0)))
        flops += 2 * B_pad * C * S * Np
        bytes_accessed += 4 * B_pad * (S * Np + C * Np)
        block_bytes += 4 * Bt * (_round_up(S, 8) * Np + _round_up(C, 8) * Np)

    # Generation-aware VMEM budget: never more than half of physical VMEM
    # (so 32 MiB on v7x, 64 MiB on v5e/v6e), and only what the blocks need.
    cap = _vmem_capacity_bytes()
    vmem_limit = int(min(cap // 2, max(8 * 1024 * 1024, 8 * block_bytes)))

    kernel = functools.partial(_slot_merge_kernel, num_slots=C,
                               has_attn=has_attn, d_pad=Dp,
                               n_real=N, n_pad=Np)

    outs = pl.pallas_call(
        kernel,
        out_shape=tuple(out_shapes),
        grid=(G,),
        in_specs=in_specs,
        out_specs=tuple(out_specs),
        compiler_params=pltpu.CompilerParams(
            dimension_semantics=("parallel",) if G > 1 else ("arbitrary",),
            vmem_limit_bytes=vmem_limit),
        cost_estimate=pl.CostEstimate(flops=int(flops), transcendentals=0,
                                      bytes_accessed=int(bytes_accessed)),
    )(*inputs)

    new_slots = outs[0][:B, :, :D]
    new_attn = outs[1][:B, :, :N] if has_attn else None

    # slot_nums = number of non-empty clusters per batch; computed directly
    # from labels in the wrapper (no lane-width-1 kernel output needed).
    member_counts = jnp.sum(jax.nn.one_hot(labels.astype(jnp.int32), C,
                                           dtype=jnp.int32), axis=1)   # (B, C)
    slot_nums = jnp.sum((member_counts > 0).astype(jnp.int32), axis=-1)
    return new_slots, new_attn, slot_nums


# ----------------------------------------------------------------------------
# Host-side clustering (replaces sklearn AgglomerativeClustering; runs on CPU
# exactly as the original module does).
# ----------------------------------------------------------------------------
def _complete_linkage_cosine_labels(x, threshold):
    """Complete-linkage agglomerative clustering, cosine distance,
    distance_threshold stopping rule (NumPy re-implementation)."""
    S = x.shape[0]
    xn = x / (np.linalg.norm(x, axis=-1, keepdims=True) + 1e-12)
    pdist = 1.0 - xn @ xn.T
    np.fill_diagonal(pdist, 0.0)

    members = {i: [i] for i in range(S)}
    while len(members) > 1:
        keys = list(members.keys())
        best_pair, best_d = None, np.inf
        for ia in range(len(keys)):
            for ib in range(ia + 1, len(keys)):
                a, b = keys[ia], keys[ib]
                d = max(pdist[p, q] for p in members[a] for q in members[b])
                if d < best_d:
                    best_d, best_pair = d, (a, b)
        if best_d >= threshold:
            break
        a, b = best_pair
        members[a].extend(members.pop(b))

    labels = np.zeros(S, dtype=np.int64)
    for new_id, key in enumerate(sorted(members.keys())):
        for m in members[key]:
            labels[m] = new_id
    return labels


def compute_cluster_labels(slots_np, num_slots, merge_coeff, drop_p):
    """Mirrors the python/numpy loop in Slot_Merger.forward."""
    B, S, _ = slots_np.shape
    labels = np.zeros((B, S), dtype=np.int64)
    for i in range(B):
        if random.random() < drop_p:
            labels[i] = np.arange(num_slots)
        else:
            lab = _complete_linkage_cosine_labels(slots_np[i], merge_coeff)
            if lab.max() <= 1:
                lab = np.arange(num_slots)
            labels[i] = lab
    return labels


# ----------------------------------------------------------------------------
# Pure-JAX reference of the device-side math (for correctness check)
# ----------------------------------------------------------------------------
def _reference(slots, patch_attn, labels, num_slots):
    labels = jnp.asarray(labels)
    eye = jnp.eye(num_slots, dtype=jnp.float32)
    clusters = eye[labels].transpose(0, 2, 1)                  # (B, C, S)
    counts = clusters.sum(-1, keepdims=True)                   # (B, C, 1)
    slot_nums = (counts[:, :, 0] > 0).sum(-1).astype(jnp.int32)
    new_slots = jnp.einsum('bij,bjd->bid', clusters, slots) / (counts + 1e-8)
    new_attn = None
    if patch_attn is not None:
        new_attn = jnp.einsum('bij,bjd->bid', clusters, patch_attn) + 1e-8
        new_attn = new_attn / new_attn.sum(-1, keepdims=True)
    return new_slots, new_attn, slot_nums


if __name__ == "__main__":
    B = 2
    NUM_SLOTS = 8          # S == num_slots in the module
    SLOT_DIM = 128
    N_PATCHES = 256
    MERGE_COEFF = 0.35     # args.slot_merge_coeff
    DROP_P = 0.1           # cluster_drop_p

    random.seed(0)
    key = jax.random.PRNGKey(0)
    k1, k2, k3 = jax.random.split(key, 3)

    # Build slots with near-duplicate pairs so clustering actually merges.
    base = jax.random.normal(k1, (B, NUM_SLOTS // 2, SLOT_DIM), jnp.float32)
    noise = 0.01 * jax.random.normal(k2, (B, NUM_SLOTS, SLOT_DIM), jnp.float32)
    slots = jnp.repeat(base, 2, axis=1) + noise                 # (B, S, D)
    patch_attn = jax.nn.softmax(
        jax.random.normal(k3, (B, NUM_SLOTS, N_PATCHES), jnp.float32), axis=-1)

    # Host-side clustering (as in the original module).
    labels_np = compute_cluster_labels(np.asarray(slots), NUM_SLOTS,
                                       MERGE_COEFF, DROP_P)
    labels = jnp.asarray(labels_np, dtype=jnp.int32)

    # 1) Pallas kernel: with patch_attn.
    new_slots, new_attn, slot_nums = slot_merger_forward(
        slots, patch_attn, labels, num_slots=NUM_SLOTS)
    jax.block_until_ready((new_slots, new_attn, slot_nums))

    ref_slots, ref_attn, ref_nums = _reference(slots, patch_attn, labels_np,
                                               NUM_SLOTS)
    assert new_slots.shape == (B, NUM_SLOTS, SLOT_DIM)
    assert new_attn.shape == (B, NUM_SLOTS, N_PATCHES)
    assert jnp.allclose(new_slots, ref_slots, atol=1e-4, rtol=1e-4)
    assert jnp.allclose(new_attn, ref_attn, atol=1e-4, rtol=1e-4)
    assert np.array_equal(np.asarray(slot_nums), np.asarray(ref_nums))

    # 2) Pallas kernel: patch_attn is None path.
    ns2, na2, sn2 = slot_merger_forward(slots, None, labels,
                                        num_slots=NUM_SLOTS)
    jax.block_until_ready((ns2, sn2))
    assert na2 is None
    assert jnp.allclose(ns2, ref_slots, atol=1e-4, rtol=1e-4)
    assert np.array_equal(np.asarray(sn2), np.asarray(ref_nums))

    # 3) Pallas kernel: ragged patch dim (not a multiple of 128) — padded in
    #    the wrapper, lane-masked epsilon in-kernel, sliced back out.
    N_RAGGED = 192
    attn_ragged = patch_attn[:, :, :N_RAGGED]
    ns3, na3, sn3 = slot_merger_forward(slots, attn_ragged, labels,
                                        num_slots=NUM_SLOTS)
    jax.block_until_ready((ns3, na3, sn3))
    ref_s3, ref_a3, ref_n3 = _reference(slots, attn_ragged, labels_np,
                                        NUM_SLOTS)
    assert na3.shape == (B, NUM_SLOTS, N_RAGGED)
    assert jnp.allclose(ns3, ref_s3, atol=1e-4, rtol=1e-4)
    assert jnp.allclose(na3, ref_a3, atol=1e-4, rtol=1e-4)
    assert np.array_equal(np.asarray(sn3), np.asarray(ref_n3))

    print("KERNEL_OK")
</pallas_src>

<mosaic_0001>
module attributes {stable_mosaic.version = 11 : i64} {
  func.func @_slot_merge_kernel(%arg0: i32, %arg1: memref<2x1x8xi32, #tpu.memory_space<vmem>>, %arg2: memref<2x8x128xf32, #tpu.memory_space<vmem>>, %arg3: memref<2x8x256xf32, #tpu.memory_space<vmem>>, %arg4: memref<2x8x128xf32, #tpu.memory_space<vmem>>, %arg5: memref<2x8x256xf32, #tpu.memory_space<vmem>>) attributes {dimension_semantics = [#tpu.dimension_semantics<arbitrary>], iteration_bounds = array<i64: 1>, scalar_prefetch = 0 : i64, scratch_operands = 0 : i64, tpu.core_type = #tpu.core_type<tc>, window_params = [{transform_indices = @transform_0, window_bounds = array<i64: 2, 1, 8>}, {transform_indices = @transform_1, window_bounds = array<i64: 2, 8, 128>}, {transform_indices = @transform_2, window_bounds = array<i64: 2, 8, 256>}, {transform_indices = @transform_3, window_bounds = array<i64: 2, 8, 128>}, {transform_indices = @transform_4, window_bounds = array<i64: 2, 8, 256>}]} {
    %c0 = arith.constant 0 : index
    %c0_0 = arith.constant 0 : index
    %c0_1 = arith.constant 0 : index
    %0 = vector.load %arg1[%c0, %c0_0, %c0_1] : memref<2x1x8xi32, #tpu.memory_space<vmem>>, vector<2x1x8xi32>
    %1 = tpu.iota {dimensions = array<i32: 1>} : vector<2x8x8xi32>
    %2 = vector.broadcast %0 : vector<2x1x8xi32> to vector<2x8x8xi32>
    %3 = arith.cmpi eq, %1, %2 : vector<2x8x8xi32>
    %4 = arith.extui %3 : vector<2x8x8xi1> to vector<2x8x8xi32>
    %5 = arith.sitofp %4 : vector<2x8x8xi32> to vector<2x8x8xf32>
    %cst = arith.constant dense<0.000000e+00> : vector<2x8xf32>
    %6 = vector.multi_reduction <add>, %5, %cst [2] : vector<2x8x8xf32> to vector<2x8xf32>
    %7 = vector.shape_cast %6 : vector<2x8xf32> to vector<2x8x1xf32>
    %cst_2 = arith.constant 9.99999993E-9 : f32
    %8 = vector.broadcast %cst_2 : f32 to vector<2x8x1xf32>
    %9 = arith.addf %7, %8 : vector<2x8x1xf32>
    %cst_3 = arith.constant 1.000000e+00 : f32
    %10 = vector.broadcast %cst_3 : f32 to vector<2x8x1xf32>
    %11 = arith.divf %10, %9 : vector<2x8x1xf32>
    %c0_4 = arith.constant 0 : index
    %c0_5 = arith.constant 0 : index
    %c0_6 = arith.constant 0 : index
    %12 = vector.load %arg2[%c0_4, %c0_5, %c0_6] : memref<2x8x128xf32, #tpu.memory_space<vmem>>, vector<2x8x128xf32>
    %c0_7 = arith.constant 0 : index
    %c0_8 = arith.constant 0 : index
    %c0_9 = arith.constant 0 : index
    %13 = vector.load %arg3[%c0_7, %c0_8, %c0_9] : memref<2x8x256xf32, #tpu.memory_space<vmem>>, vector<2x8x256xf32>
    %14 = tpu.concatenate %12, %13 in 2 : vector<2x8x128xf32>, vector<2x8x256xf32> -> vector<2x8x384xf32>
    "tpu.trace_start"() <{level = 10 : i32, message = "bcs,bsf->bcf"}> : () -> ()
    %cst_10 = arith.constant dense<0.000000e+00> : vector<2x8x384xf32>
    %15 = tpu.matmul %5, %14, %cst_10 {dimension_numbers = #tpu.dot_dimension_numbers<[2], [1], [1], [2], [0, 0, 0, 1, 1, 2], [0], [0]>} : vector<2x8x8xf32>, vector<2x8x384xf32>, vector<2x8x384xf32> -> vector<2x8x384xf32>
    "tpu.trace_stop"() : () -> ()
    %16 = vector.extract_strided_slice %15 {offsets = [0, 0, 0], sizes = [2, 8, 128], strides = [1, 1, 1]} : vector<2x8x384xf32> to vector<2x8x128xf32>
    %17 = vector.broadcast %11 : vector<2x8x1xf32> to vector<2x8x128xf32>
    %18 = arith.mulf %16, %17 : vector<2x8x128xf32>
    %c0_11 = arith.constant 0 : index
    %c0_12 = arith.constant 0 : index
    %c0_13 = arith.constant 0 : index
    %19 = vector.load %arg4[%c0_11, %c0_12, %c0_13] : memref<2x8x128xf32, #tpu.memory_space<vmem>>, vector<2x8x128xf32>
    tpu.vector_store %arg4[%c0_11, %c0_12, %c0_13], %18 {strides = array<i32>} : memref<2x8x128xf32, #tpu.memory_space<vmem>>, vector<2x8x128xf32>,
    %20 = vector.extract_strided_slice %15 {offsets = [0, 0, 128], sizes = [2, 8, 256], strides = [1, 1, 1]} : vector<2x8x384xf32> to vector<2x8x256xf32>
    %cst_14 = arith.constant 9.99999993E-9 : f32
    %21 = vector.broadcast %cst_14 : f32 to vector<2x8x256xf32>
    %22 = arith.addf %20, %21 : vector<2x8x256xf32>
    %cst_15 = arith.constant dense<0.000000e+00> : vector<2x8xf32>
    %23 = vector.multi_reduction <add>, %22, %cst_15 [2] : vector<2x8x256xf32> to vector<2x8xf32>
    %24 = vector.shape_cast %23 : vector<2x8xf32> to vector<2x8x1xf32>
    %cst_16 = arith.constant 1.000000e+00 : f32
    %25 = vector.broadcast %cst_16 : f32 to vector<2x8x1xf32>
    %26 = arith.divf %25, %24 : vector<2x8x1xf32>
    %27 = vector.broadcast %26 : vector<2x8x1xf32> to vector<2x8x256xf32>
    %28 = arith.mulf %22, %27 : vector<2x8x256xf32>
    %c0_17 = arith.constant 0 : index
    %c0_18 = arith.constant 0 : index
    %c0_19 = arith.constant 0 : index
    %29 = vector.load %arg5[%c0_17, %c0_18, %c0_19] : memref<2x8x256xf32, #tpu.memory_space<vmem>>, vector<2x8x256xf32>
    tpu.vector_store %arg5[%c0_17, %c0_18, %c0_19], %28 {strides = array<i32>} : memref<2x8x256xf32, #tpu.memory_space<vmem>>, vector<2x8x256xf32>,
    return
  }
  func.func @transform_0(%arg0: i32) -> (i32, i32, i32) {
    %c0_i32 = arith.constant 0 : i32
    %c0_i32_0 = arith.constant 0 : i32
    %c0_i32_1 = arith.constant 0 : i32
    return %arg0, %c0_i32, %c0_i32_0 : i32, i32, i32
  }
  func.func @transform_1(%arg0: i32) -> (i32, i32, i32) {
    %c0_i32 = arith.constant 0 : i32
    %c0_i32_0 = arith.constant 0 : i32
    %c0_i32_1 = arith.constant 0 : i32
    return %arg0, %c0_i32, %c0_i32_0 : i32, i32, i32
  }
  func.func @transform_2(%arg0: i32) -> (i32, i32, i32) {
    %c0_i32 = arith.constant 0 : i32
    %c0_i32_0 = arith.constant 0 : i32
    %c0_i32_1 = arith.constant 0 : i32
    return %arg0, %c0_i32, %c0_i32_0 : i32, i32, i32
  }
  func.func @transform_3(%arg0: i32) -> (i32, i32, i32) {
    %c0_i32 = arith.constant 0 : i32
    %c0_i32_0 = arith.constant 0 : i32
    %c0_i32_1 = arith.constant 0 : i32
    return %arg0, %c0_i32, %c0_i32_0 : i32, i32, i32
  }
  func.func @transform_4(%arg0: i32) -> (i32, i32, i32) {
    %c0_i32 = arith.constant 0 : i32
    %c0_i32_0 = arith.constant 0 : i32
    %c0_i32_1 = arith.constant 0 : i32
    return %arg0, %c0_i32, %c0_i32_0 : i32, i32, i32
  }
}

</mosaic_0001>

<bundles_post_ra>
// kernel: tpu_custom_call.1
= control target key start
LH: loop header
LB: loop body
LE: loop exit
PB: predicated region body
PF: predicated region fallthrough
CT: control target
= control target key end

     0   :  { %10 = vsyncpa [#allocation3], 0  ;;  %s580_s0 = inlined_call_operand.hbm [shape: s32[2,1,8], index: 0, kind: input, shape index: {}]   ;;  %s581_s1 = inlined_call_operand.hbm [shape: f32[2,8,128], index: 1, kind: input, shape index: {}]   ;;  %s582_s2 = inlined_call_operand.hbm [shape: f32[2,8,256], index: 2, kind: input, shape index: {}]   ;;  %s583_s3 = inlined_call_operand.hbm [shape: f32[2,8,128], index: 3, kind: output, shape index: {0}]   ;;  %s584_s4 = inlined_call_operand.hbm [shape: f32[2,8,256], index: 4, kind: output, shape index: {1}]  }
   0x1   :  { %11 = vsyncpa [#allocation6], 0 }
   0x2   :  { %12 = vsyncpa [#allocation4], 0  ;;  %s31_s17 = sshll.u32 %s581_s1, 4  ;;  %s32_s17 = int_to_ptr.hbm [resolvable:$true] %s31_s17 }
   0x3   :  { %13 = vsyncpa [#allocation10], 0  ;;  %s495_s18 = smov [#allocation5]   ;;  %s18_s22 = sshll.u32 %s580_s0, 4  ;;  %s19_s22 = int_to_ptr.hbm [resolvable:$true] %s18_s22 }
   0x4   :  { %s33_s19 = sshll.u32 %s495_s18, 4  ;;  %s496_s23 = smov 128   ;;  %s34_s19 = int_to_ptr.vmem [resolvable:$true] %s33_s19 }
   0x5   :  { %s497_s24 = smov 8   ;;  %s498_s25 = smov [#allocation2]  }
   0x6   :  { %39 = dma.hbm_to_vmem [thread:$0]  %s32_s17, 256, %s34_s19, [#allocation6], %s496_s23, %s496_s23, %s497_s24  }
   0x7   :  { %s20_s26 = sshll.u32 %s498_s25, 4  ;;  %s499_s1 = smov 16   ;;  %s21_s26 = int_to_ptr.vmem [resolvable:$true] %s20_s26 }
   0x8   :  { %s500_s27 = smov 1   ;;  %s44_s30 = sshll.u32 %s582_s2, 4  ;;  %s45_s30 = int_to_ptr.hbm [resolvable:$true] %s44_s30 }
   0x9   :  { %26 = dma.hbm_to_vmem [thread:$0]  %s19_s22, 32, %s21_s26, [#allocation3], %s499_s1, %s499_s1, %s500_s27  }
   0xa   :  { %s501_s0 = smov [#allocation7]   ;;  %s502_s6 = smov 256  }
   0xb   :  { %s46_s5 = sshll.u32 %s501_s0, 4  ;;  %s47_s5 = int_to_ptr.vmem [resolvable:$true] %s46_s5 }
   0xc   :  { %52 = dma.hbm_to_vmem [thread:$0]  %s45_s30, 512, %s47_s5, [#allocation6], %s502_s6, %s502_s6, %s499_s1  }
   0xd   :  { %487 = dma.done.wait [#allocation3], 32  }
   0xe   :  { %488 = vsyncadd [#allocation3], 4294967264 }
   0xf   :  { %489 = dma.done.wait [#allocation6], 768  }
  0x10   :  { %490 = vsyncadd [#allocation6], 4294966528  ;;  %v67_v0 = vlaneseq  ;;  %v119_v2 = vld [vmem:[#allocation7 + $0x8] sm:$0xff]  ;;  %vm77_vm0 = vcmask 64512   ;;  %v116_v4 = vld [vmem:[#allocation5] sm:$0xff]  ;;  %v503_v9 = vmov 0.0  }
  0x11   :  { %v357_v3 = vld [vmem:[#allocation2] ss:$0 sm:$0xff]  ;;  %180 = vmatpush.msra.mxu2 %v119_v2  ;;  %v118_v5 = vld [vmem:[#allocation7] sm:$0xff]  ;;  %v120_v6 = vld [vmem:[#allocation7 + $0x10] sm:$0xff]  ;;  %140 = vmatpush.msra.mxu0 %v116_v4  ;;  %s504_s2 = smov [#allocation8]   ;;  %s306_s10 = sshll.u32 %s583_s3, 4  ;;  %s307_s10 = int_to_ptr.hbm [resolvable:$true] %s306_s10 }
  0x12   :  { %v68_v1 = vshrl.u32 %v67_v0, 7  ;;  %160 = vmatpush.msra.mxu1 %v118_v5  ;;  %v121_v7 = vld [vmem:[#allocation7 + $0x18] sm:$0xff]  ;;  %v358_v8 = vld [vmem:[#allocation2 + $0x1] ss:$0 sm:$0xff]  ;;  %s304_s7 = sshll.u32 %s504_s2, 4  ;;  %s505_s3 = smov [#allocation9]   ;;  %s305_s7 = int_to_ptr.vmem [resolvable:$true] %s304_s7 }
  0x13   :  { %223 = vmatpush.msrb.mxu0 %v120_v6  ;;  %v117_v14 = vld [vmem:[#allocation5 + $0x8] sm:$0xff]  ;;  %s317_s11 = sshll.u32 %s505_s3, 4  ;;  %s319_s14 = sshll.u32 %s584_s4, 4  ;;  %s318_s11 = int_to_ptr.vmem [resolvable:$true] %s317_s11  ;;  %s320_s14 = int_to_ptr.hbm [resolvable:$true] %s319_s14 }
  0x14   :  { %vm71_vm1 = vcmp.eq.s32.totalorder %v68_v1, %v357_v3  ;;  %243 = vmatpush.msrb.mxu1 %v121_v7  ;;  %vm72_vm2 = vcmp.eq.s32.totalorder %v68_v1, %v358_v8  ;;  %203 = vmatpush.msra.mxu3 %v117_v14 }
  0x15   :  { %v338_v10 = vsel %vm71_vm1, 1.0, %v503_v9  ;;  %v339_v12 = vsel %vm72_vm2, 1.0, %v503_v9 }
  0x16   :  { %342 = vmatmul.msk.f32.vlgmr.msra.gmra.mxu2 %vm77_vm0, %v338_v10  ;;  %v78_v11 = vsel %vm77_vm0, %v338_v10, 0.0  ;;  %340 = vmatmul.msk.f32.vlgmr.msra.gmra.mxu0 %vm77_vm0, %v338_v10  ;;  %v81_v13 = vsel %vm77_vm0, %v339_v12, 0.0 }
  0x17   :  { %79 = vadd.xlane.f32.xlu0 %v78_v11  ;;  %341 = vmatmul.msk.f32.vlgmr.msra.gmra.mxu1 %vm77_vm0, %v338_v10 }
  0x18   :  { %343 = vmatmul.msk.f32.vlgmr.msra.gmra.mxu3 %vm77_vm0, %v339_v12 }
  0x1e   :  { %344 = vmatmul.msk.f32.vlgmr.msrb.gmra.mxu0 %vm77_vm0, %v339_v12 }
  0x1f   :  { %345 = vmatmul.msk.f32.vlgmr.msrb.gmra.mxu1 %vm77_vm0, %v339_v12  ;;  %82 = vadd.xlane.f32.xlu0 %v81_v13 }
  0x8a   :  { %v80_v15 = vpop.xlane.xlu0 %79 }
  0x8b   :  { %v84_v16 = vadd.f32 1e-08, %v80_v15 }
  0x8d   :  { %359 = vrcp.f32 %v84_v16  ;;  %v97_v21 = vand.u32 2147483648, %v84_v16  ;;  %vm91_vm3 = vweird.f32 %v84_v16  ;;  %v95_v23 = vand.u32 2147483647, %v84_v16 }
  0x8f   :  { %v98_v26 = vor.u32 1.1754944e-38, %v97_v21  ;;  %vm96_vm6 = vcmp.eq.f32.partialorder %v95_v23, 8.507059e+37 }
  0x92   :  { %v83_v39 = vpop.xlane.xlu0 %82 }
  0x93   :  { %v360_v17 = vpop.eup %359  ;;  %v142_v18 = vpop.f32.mrf.mxu0  ;;  %v85_v40 = vadd.f32 1e-08, %v83_v39 }
  0x94   :  { %v87_v19 = vmul.f32 %v360_v17, %v84_v16  ;;  %v162_v20 = vpop.f32.mrf.mxu1  ;;  %vm92_vm4 = vweird.f32 %v360_v17 }
  0x95   :  { %v556_v25 = vadd.f32 1e-08, %v162_v20  ;;  %vm93_vm5 = vmor %vm91_vm3, %vm92_vm4  ;;  %361 = vrcp.f32 %v85_v40  ;;  %v112_v45 = vand.u32 2147483648, %v85_v40  ;;  %vm106_vm7 = vweird.f32 %v85_v40 }
  0x96   :  { %v88_v22 = vsub.f32 1.0, %v87_v19  ;;  %v110_v47 = vand.u32 2147483647, %v85_v40 }
  0x97   :  { %v113_v48 = vor.u32 1.1754944e-38, %v112_v45 }
  0x98   :  { %v89_v24 = vmul.f32 %v360_v17, %v88_v22  ;;  %vm111_vm10 = vcmp.eq.f32.partialorder %v110_v47, 8.507059e+37 }
  0x99   :  { %v182_v27 = vpop.f32.mrf.mxu2 }
  0x9a   :  { %v90_v28 = vadd.f32 %v360_v17, %v89_v24  ;;  %v253_v29 = vadd.f32 1e-08, %v182_v27 }
  0x9b   :  { %v225_v30 = vpop.f32.mrf.mxu0  ;;  %v362_v41 = vpop.eup %361 }
  0x9c   :  { %v94_v31 = vsel %vm93_vm5, %v360_v17, %v90_v28  ;;  %v256_v32 = vadd.f32 %v253_v29, %v556_v25  ;;  %v245_v33 = vpop.f32.mrf.mxu1  ;;  %v559_v36 = vadd.f32 1e-08, %v225_v30  ;;  %v102_v42 = vmul.f32 %v362_v41, %v85_v40  ;;  %v205_v51 = vpop.f32.mrf.mxu3 }
  0x9d   :  { %v99_v34 = vsel %vm96_vm6, %v98_v26, %v94_v31  ;;  %v561_v37 = vadd.f32 1e-08, %v245_v33  ;;  %vm107_vm8 = vweird.f32 %v362_v41 }
  0x9e   :  { %v248_v35 = vmul.f32 %v142_v18, %v99_v34  ;;  %257 = vadd.xlane.f32.xlu1 %v256_v32  ;;  %v103_v43 = vsub.f32 1.0, %v102_v42  ;;  %vm108_vm9 = vmor %vm106_vm7, %vm107_vm8 }
  0x9f   :  { %v259_v38 = vadd.f32 %v561_v37, %v559_v36 }
  0xa0   :  { %250 = vst [vmem:[#allocation8] sm:$0xff] %v248_v35  ;;  %v104_v44 = vmul.f32 %v362_v41, %v103_v43 }
  0xa2   :  { %v105_v46 = vadd.f32 %v362_v41, %v104_v44 }
  0xa4   :  { %v109_v49 = vsel %vm108_vm9, %v362_v41, %v105_v46 }
  0xa5   :  { %v114_v50 = vsel %vm111_vm10, %v113_v48, %v109_v49 }
  0xa6   :  { %260 = vadd.xlane.f32.xlu1 %v259_v38  ;;  %v249_v52 = vmul.f32 %v205_v51, %v114_v50 }
  0xa8   :  { %251 = vst [vmem:[#allocation8 + $0x8] sm:$0xff] %v249_v52 }
  0xa9   :  { %312 = dma.vmem_to_hbm [thread:$0]  %s305_s7, 256, %s307_s10, [#allocation4], %s496_s23, %s496_s23, %s497_s24  }
 0x111   :  { %v258_v53 = vpop.xlane.xlu1 %257 }
 0x112   :  { %363 = vrcp.f32 %v258_v53  ;;  %v273_v58 = vand.u32 2147483648, %v258_v53  ;;  %v271_v60 = vand.u32 2147483647, %v258_v53  ;;  %vm267_vm12 = vweird.f32 %v258_v53 }
 0x114   :  { %v274_v63 = vor.u32 1.1754944e-38, %v273_v58  ;;  %vm272_vm14 = vcmp.eq.f32.partialorder %v271_v60, 8.507059e+37 }
 0x118   :  { %v364_v54 = vpop.eup %363 }
 0x119   :  { %v263_v55 = vmul.f32 %v364_v54, %v258_v53  ;;  %v261_v56 = vpop.xlane.xlu1 %260  ;;  %vm268_vm11 = vweird.f32 %v364_v54 }
 0x11a   :  { %365 = vrcp.f32 %v261_v56  ;;  %vm269_vm13 = vmor %vm267_vm12, %vm268_vm11  ;;  %v288_v6 = vand.u32 2147483648, %v261_v56  ;;  %v286_v8 = vand.u32 2147483647, %v261_v56  ;;  %vm282_vm0 = vweird.f32 %v261_v56 }
 0x11b   :  { %v264_v57 = vsub.f32 1.0, %v263_v55 }
 0x11c   :  { %v289_v10 = vor.u32 1.1754944e-38, %v288_v6  ;;  %vm287_vm2 = vcmp.eq.f32.partialorder %v286_v8, 8.507059e+37 }
 0x11d   :  { %v265_v59 = vmul.f32 %v364_v54, %v264_v57 }
 0x11f   :  { %v266_v61 = vadd.f32 %v364_v54, %v265_v59 }
 0x120   :  { %v366_v62 = vpop.eup %365 }
 0x121   :  { %v270_v0 = vsel %vm269_vm13, %v364_v54, %v266_v61  ;;  %v278_v1 = vmul.f32 %v366_v62, %v261_v56  ;;  %vm283_vm15 = vweird.f32 %v366_v62 }
 0x122   :  { %v275_v2 = vsel %vm272_vm14, %v274_v63, %v270_v0  ;;  %vm284_vm1 = vmor %vm282_vm0, %vm283_vm15 }
 0x123   :  { %v292_v3 = vmul.f32 %v275_v2, %v556_v25  ;;  %v293_v4 = vmul.f32 %v275_v2, %v253_v29  ;;  %v279_v5 = vsub.f32 1.0, %v278_v1 }
 0x125   :  { %296 = vst [vmem:[#allocation9] sm:$0xff] %v292_v3  ;;  %v280_v7 = vmul.f32 %v366_v62, %v279_v5 }
 0x126   :  { %297 = vst [vmem:[#allocation9 + $0x8] sm:$0xff] %v293_v4 }
 0x127   :  { %v281_v9 = vadd.f32 %v366_v62, %v280_v7 }
 0x129   :  { %v285_v11 = vsel %vm284_vm1, %v366_v62, %v281_v9 }
 0x12a   :  { %v290_v12 = vsel %vm287_vm2, %v289_v10, %v285_v11 }
 0x12b   :  { %v294_v13 = vmul.f32 %v290_v12, %v559_v36  ;;  %v295_v14 = vmul.f32 %v290_v12, %v561_v37 }
 0x12d   :  { %298 = vst [vmem:[#allocation9 + $0x10] sm:$0xff] %v294_v13 }
 0x12e   :  { %299 = vst [vmem:[#allocation9 + $0x18] sm:$0xff] %v295_v14 }
 0x12f   :  { %325 = dma.vmem_to_hbm [thread:$0]  %s318_s11, 512, %s320_s14, [#allocation10], %s502_s6, %s502_s6, %s499_s1  }
 0x130   :  { %491 = dma.done.wait [#allocation4], 256  }
 0x131   :  { %492 = vsyncadd [#allocation4], 4294967040 }
 0x132   :  { %493 = dma.done.wait [#allocation10], 512  }
 0x133   :  { %494 = vsyncadd [#allocation10], 4294966784 }
 0x134   :  { %334 = vsyncpa [#allocation3], 1 }
 0x135   :  { %335 = vsyncpa [#allocation6], 1 }
 0x136   :  { %336 = vsyncpa [#allocation4], 1 }
 0x137   :  { %337 = vsyncpa [#allocation10], 1 }

</bundles_post_ra>
